<compile_context>
chip_gen: v7x
topology: tpu7x:2x2x1
jax: 0.10.0
libtpu: 0.0.40
codegen_flags: <defaults>
</compile_context>

<pallas_src>
import functools

import jax
import jax.numpy as jnp
from jax.experimental import pallas as pl
from jax.experimental.pallas import tpu as pltpu


# ---------------------------------------------------------------------------
# VMEM budgeting (v7x: 64 MiB per TC; v5e/v6e: 128 MiB)
# ---------------------------------------------------------------------------
@functools.lru_cache(maxsize=None)
def _vmem_limit_bytes():
    cap = 64 * 1024 * 1024                       # conservative default (v7x)
    try:
        cap = int(pltpu.get_tpu_info().vmem_capacity_bytes)
    except Exception:
        pass
    cap = max(64 * 1024 * 1024, min(cap, 128 * 1024 * 1024))
    # Leave headroom for Mosaic internals; 96 MiB is plenty for <=16 MiB tiles.
    return int(min(cap - 16 * 1024 * 1024, 96 * 1024 * 1024))


def _pick_tile_t(C, T, vmem_limit):
    """Lane-dense T tile for the streamed path.

    Pass 2 holds ~2x input + 2x output double buffers plus f32 intermediates,
    i.e. roughly 6 f32-sized copies of a tile, so budget elements = limit/24.
    """
    elem_budget = vmem_limit // 24
    tile = (elem_budget // max(C, 1)) // 128 * 128
    tile = max(128, tile)
    if tile >= T:
        return T                                  # full dim is always legal
    return tile


# ---------------------------------------------------------------------------
# Fused single-pass kernels (whole (C, T) slab resident in VMEM)
# ---------------------------------------------------------------------------
def _fused_affine_kernel(x_ref, gamma_ref, beta_ref, o_ref, *, inv_n, eps):
    x = x_ref[...].astype(jnp.float32)                    # (C, T)
    mean = jnp.sum(x, keepdims=True) * inv_n              # (1, 1)
    xc = x - mean
    var = jnp.sum(xc * xc, keepdims=True) * inv_n         # exact two-pass var
    inv_std = jax.lax.rsqrt(var + eps)                    # (1, 1)
    scale = gamma_ref[...].astype(jnp.float32) * inv_std  # (C, 1)
    beta = beta_ref[...].astype(jnp.float32)              # (C, 1)
    o_ref[...] = (xc * scale + beta).astype(o_ref.dtype)


def _fused_plain_kernel(x_ref, o_ref, *, inv_n, eps):
    x = x_ref[...].astype(jnp.float32)
    mean = jnp.sum(x, keepdims=True) * inv_n
    xc = x - mean
    var = jnp.sum(xc * xc, keepdims=True) * inv_n
    inv_std = jax.lax.rsqrt(var + eps)
    o_ref[...] = (xc * inv_std).astype(o_ref.dtype)


# ---------------------------------------------------------------------------
# Streamed pass 1: per-channel partial sum / sum-of-squares over (C, tT) tiles
# ---------------------------------------------------------------------------
def _stats_kernel(x_ref, sum_ref, sumsq_ref, psum_ref, psumsq_ref,
                  *, total_t, tile_t, mask_tail):
    t = pl.program_id(1)
    nt = pl.num_programs(1)

    @pl.when(t == 0)
    def _():
        psum_ref[...] = jnp.zeros_like(psum_ref)
        psumsq_ref[...] = jnp.zeros_like(psumsq_ref)

    def _accumulate(x):
        # Lane reduce over T only; per-channel partials stay resident in VMEM
        # scratch and the cross-channel reduce happens once at the last tile.
        psum_ref[...] += jnp.sum(x, axis=1, keepdims=True)         # (C, 1)
        psumsq_ref[...] += jnp.sum(x * x, axis=1, keepdims=True)   # (C, 1)

    if mask_tail:
        # Gate the tail mask to the last tile only; every other tile takes the
        # cheap unmasked path (keeps pass 1 HBM-bound on v7x).
        @pl.when(t < nt - 1)
        def _():
            _accumulate(x_ref[...].astype(jnp.float32))

        @pl.when(t == nt - 1)
        def _():
            x = x_ref[...].astype(jnp.float32)
            col = jax.lax.broadcasted_iota(jnp.int32, x.shape, 1)
            valid = (t * tile_t + col) < total_t
            _accumulate(jnp.where(valid, x, 0.0))
    else:
        _accumulate(x_ref[...].astype(jnp.float32))

    @pl.when(t == nt - 1)
    def _():
        sum_ref[...] = jnp.sum(psum_ref[...], keepdims=True)       # (1, 1)
        sumsq_ref[...] = jnp.sum(psumsq_ref[...], keepdims=True)   # (1, 1)


# ---------------------------------------------------------------------------
# Streamed pass 2: normalize + fused affine (per-channel scale/shift)
# ---------------------------------------------------------------------------
def _norm_affine_kernel(sum_ref, sumsq_ref, x_ref, gamma_ref, beta_ref, o_ref,
                        *, inv_n, eps):
    mean = sum_ref[...] * inv_n                            # (1, 1) f32
    # TODO(synk): streamed E[x^2]-mean^2 can lose bits for far-from-zero-mean
    # inputs; the fused path (common case) already uses the exact formula.
    var = jnp.maximum(sumsq_ref[...] * inv_n - mean * mean, 0.0)
    inv_std = jax.lax.rsqrt(var + eps)
    scale = gamma_ref[...].astype(jnp.float32) * inv_std   # (C, 1)
    shift = beta_ref[...].astype(jnp.float32) - mean * scale
    # f32 math (the pass is HBM-bound so it's free), one rounding at the store.
    o_ref[...] = (x_ref[...].astype(jnp.float32) * scale + shift).astype(o_ref.dtype)


def _norm_plain_kernel(sum_ref, sumsq_ref, x_ref, o_ref, *, inv_n, eps):
    mean = sum_ref[...] * inv_n
    var = jnp.maximum(sumsq_ref[...] * inv_n - mean * mean, 0.0)
    inv_std = jax.lax.rsqrt(var + eps)
    shift = -mean * inv_std
    o_ref[...] = (x_ref[...].astype(jnp.float32) * inv_std + shift).astype(o_ref.dtype)


# ---------------------------------------------------------------------------
# Wrapper
# ---------------------------------------------------------------------------
def global_channel_layer_norm(x, gamma=None, beta=None, *, eps=1e-5,
                              elementwise_affine=True, tile_t=None):
    """x: (N, C, T); gamma, beta: (C, 1) (only if elementwise_affine).

    If `tile_t` is given, the streamed two-pass path is forced with that tile.
    """
    if x.ndim != 3:
        raise RuntimeError("GlobalChannelLayerNorm accepts 3D tensor as input")
    N, C, T = x.shape
    itemsize = jnp.dtype(x.dtype).itemsize
    vmem_limit = _vmem_limit_bytes()
    inv_n = 1.0 / float(C * T)

    # ----------------- fused single-pass path (slab fits in VMEM) -----------
    # ~6 f32-sized slab copies live at once (2x in + 2x out double buffers plus
    # f32 intermediates), so require 6 * C*T*4 <= vmem_limit.
    fused_ok = tile_t is None and 6 * C * T * 4 <= vmem_limit
    if fused_ok:
        slab_spec = pl.BlockSpec((None, C, T), lambda b: (b, 0, 0))
        if elementwise_affine:
            kernel = functools.partial(_fused_affine_kernel, inv_n=inv_n, eps=eps)
            in_specs = [slab_spec,
                        pl.BlockSpec((C, 1), lambda b: (0, 0)),
                        pl.BlockSpec((C, 1), lambda b: (0, 0))]
            args = (x, gamma, beta)
        else:
            kernel = functools.partial(_fused_plain_kernel, inv_n=inv_n, eps=eps)
            in_specs = [slab_spec]
            args = (x,)
        return pl.pallas_call(
            kernel,
            out_shape=jax.ShapeDtypeStruct((N, C, T), x.dtype),
            grid_spec=pltpu.PrefetchScalarGridSpec(
                num_scalar_prefetch=0,
                grid=(N,),
                in_specs=in_specs,
                out_specs=pl.BlockSpec((None, C, T), lambda b: (b, 0, 0)),
            ),
            compiler_params=pltpu.CompilerParams(
                dimension_semantics=("parallel",),
                vmem_limit_bytes=vmem_limit,
            ),
            cost_estimate=pl.CostEstimate(
                flops=6 * N * C * T,
                transcendentals=N,
                bytes_accessed=2 * N * C * T * itemsize,
            ),
        )(*args)

    # ----------------- streamed two-pass fallback ---------------------------
    tT = tile_t if tile_t is not None else _pick_tile_t(C, T, vmem_limit)
    nT = pl.cdiv(T, tT)
    mask_tail = (T % tT) != 0

    # pass 1: statistics
    stats_kernel = functools.partial(
        _stats_kernel, total_t=T, tile_t=tT, mask_tail=mask_tail)
    stats_shape = jax.ShapeDtypeStruct((N, 1, 1), jnp.float32)
    s1, s2 = pl.pallas_call(
        stats_kernel,
        out_shape=(stats_shape, stats_shape),
        grid_spec=pltpu.PrefetchScalarGridSpec(
            num_scalar_prefetch=0,
            grid=(N, nT),
            in_specs=[pl.BlockSpec((None, C, tT), lambda b, t: (b, 0, t))],
            out_specs=(pl.BlockSpec((None, 1, 1), lambda b, t: (b, 0, 0)),
                       pl.BlockSpec((None, 1, 1), lambda b, t: (b, 0, 0))),
            scratch_shapes=[pltpu.VMEM((C, 1), jnp.float32),
                            pltpu.VMEM((C, 1), jnp.float32)],
        ),
        compiler_params=pltpu.CompilerParams(
            dimension_semantics=("parallel", "arbitrary"),
            vmem_limit_bytes=vmem_limit,
        ),
        cost_estimate=pl.CostEstimate(
            flops=3 * N * C * T,
            transcendentals=0,
            bytes_accessed=N * C * T * itemsize + 2 * N * 4,
        ),
    )(x)

    # pass 2: normalize (+ fused affine)
    stat_spec = pl.BlockSpec((None, 1, 1), lambda b, t: (b, 0, 0))
    x_spec = pl.BlockSpec((None, C, tT), lambda b, t: (b, 0, t))
    out_spec = pl.BlockSpec((None, C, tT), lambda b, t: (b, 0, t))

    if elementwise_affine:
        kernel = functools.partial(_norm_affine_kernel, inv_n=inv_n, eps=eps)
        in_specs = [stat_spec, stat_spec, x_spec,
                    pl.BlockSpec((C, 1), lambda b, t: (0, 0)),
                    pl.BlockSpec((C, 1), lambda b, t: (0, 0))]
        args = (s1, s2, x, gamma, beta)
    else:
        kernel = functools.partial(_norm_plain_kernel, inv_n=inv_n, eps=eps)
        in_specs = [stat_spec, stat_spec, x_spec]
        args = (s1, s2, x)

    return pl.pallas_call(
        kernel,
        out_shape=jax.ShapeDtypeStruct((N, C, T), x.dtype),
        grid_spec=pltpu.PrefetchScalarGridSpec(
            num_scalar_prefetch=0,
            grid=(N, nT),
            in_specs=in_specs,
            out_specs=out_spec,
        ),
        compiler_params=pltpu.CompilerParams(
            dimension_semantics=("parallel", "parallel"),
            vmem_limit_bytes=vmem_limit,
        ),
        cost_estimate=pl.CostEstimate(
            flops=2 * N * C * T,
            transcendentals=N,
            bytes_accessed=2 * N * C * T * itemsize,
        ),
    )(*args)


# ---------------------------------------------------------------------------
# Reference + tests
# ---------------------------------------------------------------------------
def _reference(x, gamma=None, beta=None, eps=1e-5, affine=True):
    xf = x.astype(jnp.float32)
    mean = jnp.mean(xf, axis=(1, 2), keepdims=True)
    var = jnp.mean((xf - mean) ** 2, axis=(1, 2), keepdims=True)
    y = (xf - mean) / jnp.sqrt(var + eps)
    if affine:
        y = gamma.astype(jnp.float32)[None] * y + beta.astype(jnp.float32)[None]
    return y.astype(x.dtype)


if __name__ == "__main__":
    key = jax.random.PRNGKey(0)
    k1, k2, k3 = jax.random.split(key, 3)

    # --- small N x C x T, fused single-pass path -----------------------------
    N, C, T = 2, 4, 16
    x = jax.random.normal(k1, (N, C, T), dtype=jnp.float32)
    gamma = jnp.ones((C, 1), dtype=jnp.float32)   # matches nn.Module init
    beta = jnp.zeros((C, 1), dtype=jnp.float32)

    out = jax.block_until_ready(global_channel_layer_norm(x, gamma, beta, eps=1e-5))
    ref = _reference(x, gamma, beta, eps=1e-5)
    assert out.shape == (N, C, T)
    assert jnp.allclose(out, ref, atol=1e-4, rtol=1e-4), "mismatch (fused affine)"

    # --- non-affine fused variant (no gamma/beta DMA) -------------------------
    out_na = jax.block_until_ready(
        global_channel_layer_norm(x, eps=1e-5, elementwise_affine=False))
    ref_na = _reference(x, eps=1e-5, affine=False)
    assert jnp.allclose(out_na, ref_na, atol=1e-4, rtol=1e-4), "mismatch (fused plain)"

    # --- streamed two-pass path, masked tail tile (forced via tile_t) --------
    N2, C2, T2 = 2, 8, 4160            # T2 % 1024 = 64 -> partial tail tile
    x2 = 3.0 + jax.random.normal(k2, (N2, C2, T2), dtype=jnp.float32)
    g2 = 1.0 + 0.1 * jax.random.normal(jax.random.PRNGKey(1), (C2, 1), jnp.float32)
    b2 = 0.1 * jax.random.normal(jax.random.PRNGKey(2), (C2, 1), jnp.float32)

    out2 = jax.block_until_ready(
        global_channel_layer_norm(x2, g2, b2, eps=1e-5, tile_t=1024))
    ref2 = _reference(x2, g2, b2, eps=1e-5)
    assert jnp.allclose(out2, ref2, atol=1e-3, rtol=1e-3), "mismatch (streamed affine)"

    out2p = jax.block_until_ready(
        global_channel_layer_norm(x2, eps=1e-5, elementwise_affine=False, tile_t=1024))
    ref2p = _reference(x2, eps=1e-5, affine=False)
    assert jnp.allclose(out2p, ref2p, atol=1e-3, rtol=1e-3), "mismatch (streamed plain)"

    # --- streamed path, exact tiling (no tail mask), single batch ------------
    x3 = jax.random.normal(k3, (1, 8, 2048), dtype=jnp.float32)
    g3 = jnp.ones((8, 1), jnp.float32)
    b3 = jnp.zeros((8, 1), jnp.float32)
    out3 = jax.block_until_ready(
        global_channel_layer_norm(x3, g3, b3, eps=1e-5, tile_t=512))
    ref3 = _reference(x3, g3, b3, eps=1e-5)
    assert jnp.allclose(out3, ref3, atol=1e-4, rtol=1e-4), "mismatch (streamed no-tail)"

    # --- bf16 input through the fused path (f32 math, cast at store) ---------
    xb = x.astype(jnp.bfloat16)
    outb = jax.block_until_ready(global_channel_layer_norm(xb, gamma, beta, eps=1e-5))
    refb = _reference(xb, gamma, beta, eps=1e-5)
    assert jnp.allclose(outb.astype(jnp.float32), refb.astype(jnp.float32),
                        atol=5e-2, rtol=5e-2), "mismatch (bf16)"

    print("KERNEL_OK")
</pallas_src>

<mosaic_0001>
module attributes {stable_mosaic.version = 11 : i64} {
  func.func @_fused_affine_kernel(%arg0: i32, %arg1: memref<1x4x16xf32, #tpu.memory_space<vmem>>, %arg2: memref<4x1xf32, #tpu.memory_space<vmem>>, %arg3: memref<4x1xf32, #tpu.memory_space<vmem>>, %arg4: memref<1x4x16xf32, #tpu.memory_space<vmem>>) attributes {dimension_semantics = [#tpu.dimension_semantics<parallel>], iteration_bounds = array<i64: 2>, scalar_prefetch = 0 : i64, scratch_operands = 0 : i64, tpu.core_type = #tpu.core_type<tc>, window_params = [{transform_indices = @transform_0, window_bounds = array<i64: 1, 4, 16>}, {pipeline_mode = #tpu.pipeline_mode<synchronous>, transform_indices = @transform_1, window_bounds = array<i64: 4, 1>}, {pipeline_mode = #tpu.pipeline_mode<synchronous>, transform_indices = @transform_2, window_bounds = array<i64: 4, 1>}, {transform_indices = @transform_3, window_bounds = array<i64: 1, 4, 16>}]} {
    %c0 = arith.constant 0 : index
    %c0_0 = arith.constant 0 : index
    %c0_1 = arith.constant 0 : index
    %0 = vector.load %arg1[%c0, %c0_0, %c0_1] : memref<1x4x16xf32, #tpu.memory_space<vmem>>, vector<1x4x16xf32>
    %1 = vector.shape_cast %0 : vector<1x4x16xf32> to vector<4x16xf32>
    %2 = vector.shape_cast %1 : vector<4x16xf32> to vector<1x4x16xf32>
    %cst = arith.constant dense<0.000000e+00> : vector<1xf32>
    %3 = vector.multi_reduction <add>, %2, %cst [1, 2] : vector<1x4x16xf32> to vector<1xf32>
    %4 = vector.shape_cast %3 : vector<1xf32> to vector<1x1x1xf32>
    %5 = vector.extract %4[0, 0, 0] : f32 from vector<1x1x1xf32>
    %6 = vector.broadcast %5 : f32 to vector<1x1xf32>
    %cst_2 = arith.constant 1.562500e-02 : f32
    %7 = vector.broadcast %cst_2 : f32 to vector<1x1xf32>
    %8 = arith.mulf %6, %7 : vector<1x1xf32>
    %9 = vector.broadcast %8 : vector<1x1xf32> to vector<4x16xf32>
    %10 = arith.subf %1, %9 : vector<4x16xf32>
    %11 = arith.mulf %10, %10 : vector<4x16xf32>
    %12 = vector.shape_cast %11 : vector<4x16xf32> to vector<1x4x16xf32>
    %cst_3 = arith.constant dense<0.000000e+00> : vector<1xf32>
    %13 = vector.multi_reduction <add>, %12, %cst_3 [1, 2] : vector<1x4x16xf32> to vector<1xf32>
    %14 = vector.shape_cast %13 : vector<1xf32> to vector<1x1x1xf32>
    %15 = vector.extract %14[0, 0, 0] : f32 from vector<1x1x1xf32>
    %16 = vector.broadcast %15 : f32 to vector<1x1xf32>
    %cst_4 = arith.constant 1.562500e-02 : f32
    %17 = vector.broadcast %cst_4 : f32 to vector<1x1xf32>
    %18 = arith.mulf %16, %17 : vector<1x1xf32>
    %cst_5 = arith.constant 9.99999974E-6 : f32
    %19 = vector.broadcast %cst_5 : f32 to vector<1x1xf32>
    %20 = arith.addf %18, %19 : vector<1x1xf32>
    %21 = math.rsqrt %20 : vector<1x1xf32>
    %c0_6 = arith.constant 0 : index
    %c0_7 = arith.constant 0 : index
    %22 = vector.load %arg2[%c0_6, %c0_7] : memref<4x1xf32, #tpu.memory_space<vmem>>, vector<4x1xf32>
    %23 = vector.broadcast %21 : vector<1x1xf32> to vector<4x1xf32>
    %24 = arith.mulf %22, %23 : vector<4x1xf32>
    %c0_8 = arith.constant 0 : index
    %c0_9 = arith.constant 0 : index
    %25 = vector.load %arg3[%c0_8, %c0_9] : memref<4x1xf32, #tpu.memory_space<vmem>>, vector<4x1xf32>
    %26 = vector.broadcast %24 : vector<4x1xf32> to vector<4x16xf32>
    %27 = arith.mulf %10, %26 : vector<4x16xf32>
    %28 = vector.broadcast %25 : vector<4x1xf32> to vector<4x16xf32>
    %29 = arith.addf %27, %28 : vector<4x16xf32>
    %c0_10 = arith.constant 0 : index
    %c0_11 = arith.constant 0 : index
    %c0_12 = arith.constant 0 : index
    %30 = vector.load %arg4[%c0_10, %c0_11, %c0_12] : memref<1x4x16xf32, #tpu.memory_space<vmem>>, vector<1x4x16xf32>
    %31 = vector.shape_cast %30 : vector<1x4x16xf32> to vector<4x16xf32>
    %32 = vector.shape_cast %29 : vector<4x16xf32> to vector<1x4x16xf32>
    tpu.vector_store %arg4[%c0_10, %c0_11, %c0_12], %32 {strides = array<i32>} : memref<1x4x16xf32, #tpu.memory_space<vmem>>, vector<1x4x16xf32>,
    return
  }
  func.func @transform_0(%arg0: i32) -> (i32, i32, i32) {
    %c0_i32 = arith.constant 0 : i32
    %c0_i32_0 = arith.constant 0 : i32
    %c0_i32_1 = arith.constant 0 : i32
    return %arg0, %c0_i32, %c0_i32_0 : i32, i32, i32
  }
  func.func @transform_1(%arg0: i32) -> (i32, i32) {
    %c0_i32 = arith.constant 0 : i32
    %c0_i32_0 = arith.constant 0 : i32
    %c0_i32_1 = arith.constant 0 : i32
    return %c0_i32, %c0_i32_0 : i32, i32
  }
  func.func @transform_2(%arg0: i32) -> (i32, i32) {
    %c0_i32 = arith.constant 0 : i32
    %c0_i32_0 = arith.constant 0 : i32
    %c0_i32_1 = arith.constant 0 : i32
    return %c0_i32, %c0_i32_0 : i32, i32
  }
  func.func @transform_3(%arg0: i32) -> (i32, i32, i32) {
    %c0_i32 = arith.constant 0 : i32
    %c0_i32_0 = arith.constant 0 : i32
    %c0_i32_1 = arith.constant 0 : i32
    return %arg0, %c0_i32, %c0_i32_0 : i32, i32, i32
  }
}

</mosaic_0001>

<bundles_post_ra>
// kernel: tpu_custom_call.1
= control target key start
LH: loop header
LB: loop body
LE: loop exit
PB: predicated region body
PF: predicated region fallthrough
CT: control target
= control target key end

     0   :  { %8 = vsyncpa [#allocation3], 0  ;;  %s538_s0 = inlined_call_operand.vmem [shape: f32[2,4,16], index: 0, kind: input, shape index: {}]   ;;  %s539_s1 = inlined_call_operand.vmem [shape: f32[4,1], index: 1, kind: input, shape index: {}]   ;;  %s540_s2 = inlined_call_operand.vmem [shape: f32[4,1], index: 2, kind: input, shape index: {}]   ;;  %s541_s3 = inlined_call_operand.hbm [shape: f32[2,4,16], index: 3, kind: output, shape index: {}]  }
   0x1   :  { %10 = vsyncpa [#allocation3 + $0x1], 0  ;;  %s429_s12 = smov 0   ;;  %s431_s13 = smov 0  }
   0x2   :  { %s433_s14 = smov 0   ;;  %s435_s15 = smov 0  }
   0x3 LB: > { %s450_s16 = sadd.s32 4294967295, %s405_s15   ;;  %s285_s17 = sadd.s32 4294967294, %s405_s15   ;;  %s405_s15 = sphi %s435_s15, %s547_s15   ;;  %s401_s14 = sphi %s433_s14, %s546_s14   ;;  %s397_s13 = sphi %s431_s13, %s545_s13   ;;  %s393_s12 = sphi %s429_s12, %s544_s12  }
   0x4   : > { %s454_s18 = sadd.s32 1, %s405_s15   ;;  %s91_s19 = sadd.s32 1, %s401_s14 }
   0x5   : > { %s88_s20 = ssub.s32 %s405_s15, %s454_s18  ;;  %p101_p0 = scmp.ne.s32.totalorder %s401_s14, %s397_s13 }
   0x6   : > { %p89_p1 = scmp.eq.s32.totalorder %s88_s20, 0  ;;  %p102_p2 = scmp.eq.s32.totalorder %s450_s16, 1 }
   0x7   : > { %p107_p3 = scmp.ne.s32.totalorder %s397_s13, %s393_s12  ;;  %p108_p4 = scmp.eq.s32.totalorder %s285_s17, 1 }
   0x8   : > { %s465_s21 = scalar_select %p89_p1, %s401_s14, %s91_s19  }
   0x9   : > { %p467_p5 = por %p102_p2, %p101_p0  ;;  %p471_p6 = por %p108_p4, %p107_p3 }
   0xa   : > { %p288_p7 = scmp.ge.s32.totalorder %s405_s15, 1  ;;  %p139_p8 = scmp.lt.s32.totalorder %s405_s15, 3 }
   0xc   : > { %p140_p9 = pnand %p288_p7, %p139_p8 }
   0xd   : > { %p162_p10 = scmp.lt.s32.totalorder (!%p140_p9), %s450_s16, 1  ;;  %vm167_vm0 = vcmask (!%p140_p9), 125952   ;;  %v407_v14 = vmov (!%p140_p9), 0   ;;  %v196_v25 = vld [vmem:[%s539_s1] sm:$0xf] (!%p140_p9)  ;;  %s159_s8 = sand.u32 (!%p140_p9), 1, %s397_s13  }
   0xe   : > { %143 = sbr.rel (%p140_p9) target bundleno = 609 (0x261), region = 32  ;;  %339 = vset.pattern.permute.xlu1 (!%p140_p9), %v407_v14  ;;  %340 = vset.pattern.permute.xlu0 (!%p140_p9), %v407_v14  ;;  %v198_v28 = vld [vmem:[%s540_s2] sm:$0xf] (!%p140_p9)  ;;  %s289_s9 = sshll.u32 (!%p140_p9), %s159_s8, 2 }
   0xf   : > { %s292_s10 = sshll.u32 (!%p140_p9), %s450_s16, 6  ;;  %s161_s11 = scalar_lea.vmem (!%p140_p9), [#allocation2], %s289_s9 }
  0x10   : > { %s226_s17 = sshll.u32 (!%p140_p9), %s161_s11, 4  ;;  %s497_s17 = int_to_ptr.vmem [resolvable:$true] %s226_s17 }
  0x11   : > { %s343_s26 = scalar_lea.vmem (!%p140_p9), %s497_s17, 64 }
  0x12   : > { %p344_p11 = scmp.ne.s32.totalorder (!%p140_p9), %s497_s17, %s343_s26 }
  0x14   : > { %p345_p12 = pnand (!%p140_p9), %p344_p11, %p467_p5 }
  0x15   : > { %s163_s24 = scalar_select %p162_p10, %s450_s16, 1 }
  0x16   : > { %p346_p13 = pneg %p345_p12  ;;  %s408_s16 = smov [#allocation2]  }
  0x17   : > { %s290_s25 = sshll.u32 %s163_s24, 2  ;;  %s495_s24 = scalar_lea.hbm %s541_s3, %s292_s10 }
  0x18   : > { %s165_s28 = scalar_lea.vmem %s538_s0, %s290_s25  ;;  %s213_s25 = scalar_lea.sflag [#allocation3], %s159_s8 }
  0x19   : > { %v166_v0 = vld [vmem:[%s165_s28] sm:$0xf]  ;;  %s347_s27 = sshll.u32 %s408_s16, 4  ;;  %s348_s27 = int_to_ptr.vmem [resolvable:$false] %s347_s27 }
  0x1a   : > { %v168_v1 = vsel %vm167_vm0, %v166_v0, 0.0  ;;  %s349_s28 = scalar_lea.vmem %s348_s27, 128  ;;  %p350_p0 = scmp.lt.s32.totalorder %s497_s17, %s348_s27 }
  0x1b   : > { %169 = vadd.xlane.f32.xlu0 %v168_v1  ;;  %p351_p1 = scmp.lt.s32.totalorder %s349_s28, %s343_s26 }
  0x1d   : > { %p352_p2 = por %p351_p1, %p350_p0 }
  0x1f   : > { %p353_p3 = pnand %p352_p2, %p346_p13 }
  0xa8   : > { %v170_v2 = vpop.xlane.xlu0 %169 }
  0xa9   : > { %v171_v3 = vrot.slane %v170_v2, 4 }
  0xab   : > { %v172_v4 = vadd.f32 %v171_v3, %v170_v2 }
  0xad   : > { %v173_v5 = vrot.slane %v172_v4, 2 }
  0xaf   : > { %v174_v6 = vadd.f32 %v173_v5, %v172_v4 }
  0xb1   : > { %v175_v7 = vrot.slane %v174_v6, 1 }
  0xb3   : > { %v176_v8 = vadd.f32 %v175_v7, %v174_v6 }
  0xb5   : > { %295 = vpush %v176_v8 }
  0xe6   : > { %s296_s29 = spop %295 }
  0xe7   : > { %v178_v9 = vstv %s296_s29 }
  0xe8   : > { %v179_v10 = vmul.f32 0.015625, %v178_v9 }
  0xea   : > { %v180_v11 = vsub.f32 %v166_v0, %v179_v10 }
  0xec   : > { %v181_v12 = vmul.f32 %v180_v11, %v180_v11 }
  0xee   : > { %v182_v13 = vsel %vm167_vm0, %v181_v12, 0.0 }
  0xef   : > { %183 = vadd.xlane.f32.xlu0 %v182_v13 }
 0x17c   : > { %v184_v15 = vpop.xlane.xlu0 %183 }
 0x17d   : > { %v185_v16 = vrot.slane %v184_v15, 4 }
 0x17f   : > { %v186_v17 = vadd.f32 %v185_v16, %v184_v15 }
 0x181   : > { %v187_v18 = vrot.slane %v186_v17, 2 }
 0x183   : > { %v188_v19 = vadd.f32 %v187_v18, %v186_v17 }
 0x185   : > { %v189_v20 = vrot.slane %v188_v19, 1 }
 0x187   : > { %v190_v21 = vadd.f32 %v189_v20, %v188_v19 }
 0x189   : > { %297 = vpush %v190_v21 }
 0x1ba   : > { %s298_s30 = spop %297 }
 0x1bb   : > { %v192_v22 = vstv %s298_s30 }
 0x1bc   : > { %v193_v23 = vmul.f32 0.015625, %v192_v22 }
 0x1be   : > { %v194_v24 = vadd.f32 1e-05, %v193_v23 }
 0x1c0   : > { %341 = vrsqrt.f32 %v194_v24 }
 0x1ca   : > { %v342_v26 = vpop.eup %341 }
 0x1cb   : > { %v197_v27 = vmul.f32 %v342_v26, %v196_v25 }
 0x1cd   : > { %201 = vperm.xlu1 %339, %v197_v27  }
 0x1d1   : > { %207 = vperm.xlu1 %339, %v198_v28  }
 0x24c   : > { %v202_v29 = vpop.permute.xlu1 %201 }
 0x24d   : > { %v204_v30 = vmul.f32 %v202_v29, %v180_v11 }
 0x250   : > { %v208_v31 = vpop.permute.xlu1 %207 }
 0x251   : > { %v210_v32 = vadd.f32 %v208_v31, %v204_v30 }
 0x253   : > { %211 = vst.msk [vmem:[%s161_s11] sm:$0xf] %vm167_vm0, %v210_v32 }
 0x254   : > { %356 = shalt.err (!%p353_p3)
}
 0x255   : > { %s357_s29 = scalar_lea.hbm %s495_s24, 64  ;;  %s361_s5 = scalar_lea.hbm %s541_s3, 128 }
 0x256   : > { %p358_p4 = scmp.ne.s32.totalorder %s495_s24, %s357_s29  ;;  %p362_p9 = scmp.lt.u32.totalorder %s495_s24, %s541_s3 }
 0x257   : > { %p363_p10 = scmp.lt.u32.totalorder %s361_s5, %s357_s29  ;;  %p365_p12 = scmp.lt.u32.totalorder %s357_s29, %s495_s24 }
 0x258   : > { %p359_p7 = pnand %p358_p4, %p467_p5 }
 0x259   : > { %p364_p11 = por %p363_p10, %p362_p9 }
 0x25a   : > { %p360_p8 = pneg %p359_p7 }
 0x25b   : > { %p366_p13 = por %p365_p12, %p364_p11 }
 0x25d   : > { %p367_p0 = pnand %p366_p13, %p360_p8 }
 0x25f   : > { %370 = shalt.err (!%p367_p0)
}
 0x260   : > { %299 = dma.vmem_to_hbm [thread:$0]  (%p467_p5), %s497_s17, 64, %s495_s24, %s213_s25  }
 0x261 PF: > { %p305_p1 = scmp.ge.s32.totalorder %s405_s15, 2  ;;  %s238_s8 = sand.u32 1, %s393_s12  }
 0x262   : > { %s239_s9 = scalar_lea.sflag [#allocation3], %s238_s8 }
 0x263   : > { %p302_p2 = pnand %p305_p1, %p471_p6 }
 0x265   : > { %388 = dma.done.wait (!%p302_p2), %s239_s9, 64  }
 0x266   : > { %390 = vsyncadd (!%p302_p2), %s239_s9, 4294967232  ;;  %p13_p3 = scmp.ge.s32.totalorder %s454_s18, 4   ;;  %s544_s12 = smov %s397_s13 }
 0x267   : > { %s545_s13 = smov %s401_s14  ;;  %s546_s14 = smov %s465_s21 }
 0x268   : > { %s547_s15 = smov %s454_s18  ;;  %15 = sbr.rel (!%p13_p3) target bundleno = 3 (0x3), region = 67 }
 0x26f   :  { %244 = vsyncpa [#allocation3], 1 }
 0x270   :  { %246 = vsyncpa [#allocation3 + $0x1], 1 }

</bundles_post_ra>
